<compile_context>
chip_gen: v6e
topology: v6e:2x2x1
jax: 0.10.0
libtpu: 0.0.40
codegen_flags: <defaults>
</compile_context>

<pallas_src>
import functools

import jax
import jax.numpy as jnp
from jax.experimental import pallas as pl
from jax.experimental.pallas import tpu as pltpu


_NEG_BIG = -1e30          # finite "minus infinity" for masking / running-max init
_LANE = 128
_MAX_BATCH_BLOCK = 8      # max batches packed per grid step
_MAX_S_TILE = 2048        # hard cap on the S tile (keeps per-step latency bounded)


# ---------------------------------------------------------------------------
# Kernels
# ---------------------------------------------------------------------------
def _attn_single_tile_kernel(q_ref, k_ref, v_ref, bias_ref, o_ref):
    """One-pass softmax attention when the whole S axis fits a single tile.

    q_ref   : (bn, Tq, C)   compute dtype (bf16 by default), pre-scaled
    k_ref   : (bn, C,  S)   compute dtype, native layout
    v_ref   : (bn, Cv, S)   compute dtype, native layout (no wrapper transpose)
    bias_ref: (bn, 1,  S)   f32, 0 for valid positions, -1e30 for masked
    o_ref   : (bn, Tq, Cv)
    """
    # (Tq, C) x (C, S): canonical MXU matmul, f32 accumulation.
    s = jnp.einsum("btc,bcs->bts", q_ref[...], k_ref[...],
                   preferred_element_type=jnp.float32)
    s = s + bias_ref[...]                      # additive mask, broadcast over Tq
    m = jnp.max(s, axis=-1, keepdims=True)
    p = jnp.exp(s - m)                         # unnormalized weights
    l = jnp.sum(p, axis=-1, keepdims=True)
    # (Tq, S) x (Cv, S)^T: contraction on the minor dim of both operands.
    pv = jnp.einsum("bts,bvs->btv", p.astype(v_ref.dtype), v_ref[...],
                    preferred_element_type=jnp.float32)
    o_ref[...] = (pv * pl.reciprocal(l, approx=False)).astype(o_ref.dtype)


def _attn_flash_kernel(q_ref, k_ref, v_ref, bias_ref, o_ref,
                       m_scr, l_scr, acc_scr, *, s_len, s_tile):
    """Flash-style online-softmax step over one (batch-block, S-tile)."""
    si = pl.program_id(1)

    @pl.when(si == 0)
    def _init():
        m_scr[...] = jnp.full(m_scr.shape, _NEG_BIG, m_scr.dtype)
        l_scr[...] = jnp.zeros(l_scr.shape, l_scr.dtype)
        acc_scr[...] = jnp.zeros(acc_scr.shape, acc_scr.dtype)

    s = jnp.einsum("btc,bcs->bts", q_ref[...], k_ref[...],
                   preferred_element_type=jnp.float32)

    v = v_ref[...]
    if (s_len % s_tile) != 0:
        # Ragged last tile: positions >= s_len hold unspecified (DMA-skipped) data.
        # Mask the logits to -1e30 and zero the V rows so garbage never reaches the
        # softmax reductions or the accumulator (no HBM-side padding copies needed).
        start = si * s_tile
        pos_s = start + jax.lax.broadcasted_iota(jnp.int32, s.shape, 2)
        s = jnp.where(pos_s < s_len, s + bias_ref[...], _NEG_BIG)
        pos_v = start + jax.lax.broadcasted_iota(jnp.int32, v.shape, 2)
        v = jnp.where(pos_v < s_len, v, jnp.zeros_like(v))
    else:
        s = s + bias_ref[...]

    # Online softmax update (state in f32 VMEM scratch).
    m_prev = m_scr[...]
    m_new = jnp.maximum(m_prev, jnp.max(s, axis=-1, keepdims=True))
    alpha = jnp.exp(m_prev - m_new)
    p = jnp.exp(s - m_new)                                 # (bn, Tq, ts)
    l_scr[...] = alpha * l_scr[...] + jnp.sum(p, axis=-1, keepdims=True)
    acc_scr[...] = alpha * acc_scr[...] + jnp.einsum(
        "bts,bvs->btv", p.astype(v.dtype), v, preferred_element_type=jnp.float32)
    m_scr[...] = m_new

    @pl.when(si == pl.num_programs(1) - 1)
    def _finalize():
        inv_l = pl.reciprocal(l_scr[...], approx=False)
        o_ref[...] = (acc_scr[...] * inv_l).astype(o_ref.dtype)


# ---------------------------------------------------------------------------
# Sizing helpers (generation-aware)
# ---------------------------------------------------------------------------
def _vmem_limit_bytes():
    try:
        cap = int(pltpu.get_tpu_info().vmem_capacity_bytes)
    except Exception:
        cap = 64 * 1024 * 1024   # conservative fallback: v7x-sized VMEM
    # ~5/8 of physical VMEM: ~40 MiB on v7x (64 MiB), ~80 MiB on v5e/v6e (128 MiB).
    return min((cap * 5) // 8, 96 * 1024 * 1024)


def _choose_batch_block(n):
    """Largest divisor of n <= _MAX_BATCH_BLOCK, capped so the 'parallel' batch
    grid axis has >= 2 steps whenever n >= 2 (keeps both v7x TensorCores busy)."""
    cap = min(_MAX_BATCH_BLOCK, n)
    if n >= 2:
        cap = min(cap, n // 2)
    cap = max(cap, 1)
    bn = 1
    for d in range(1, cap + 1):
        if n % d == 0:
            bn = d
    return bn


def _choose_s_tile(s_len, bn, c, cv, itemsize, vmem_limit):
    """Largest 128-multiple S tile whose double-buffered K/V/bias streams fit
    ~half the VMEM limit (the rest is headroom for q/out/acc/compiler scratch)."""
    budget = vmem_limit // 2
    per_s = 2 * bn * ((c + cv) * itemsize + 4)   # 2x-buffered K+V (+f32 bias) per S elem
    ts = (budget // max(per_s, 1)) // _LANE * _LANE
    ts = max(_LANE, min(ts, _MAX_S_TILE))
    if s_len <= ts:
        return s_len            # whole S in one tile -> fast path
    return ts


# ---------------------------------------------------------------------------
# Wrapper
# ---------------------------------------------------------------------------
def dot_product_attention(query, key, value, mask=None, dim_model=None,
                          compute_dtype=jnp.bfloat16, s_tile=None):
    """Pallas implementation of DotProductAttentionLayer.forward.

    Args:
      query: (N, C, Tq) float32
      key:   (N, C, S)  float32
      value: (N, Cv, S) float32
      mask:  (N, S) bool (True == masked out) or None
      dim_model: optional int; scale = dim_model ** -0.5
      compute_dtype: MXU input dtype (bf16 default halves K/V HBM bytes);
        softmax state and matmul accumulation are always f32.
      s_tile: optional S-tile override (multiple of 128, or >= S). Mainly for tests.
    Returns:
      glimpse: (N, Cv, Tq) in query.dtype
    """
    n, c, tq = query.shape
    _, _, s_len = key.shape
    _, cv, _ = value.shape
    out_dtype = query.dtype
    scale = float(dim_model) ** (-0.5) if dim_model is not None else 1.0

    # Wrapper-side prep (each a single fused XLA pass; K/V keep their native layout,
    # so the only HBM-copy is the tiny Q transpose):
    q_c = jnp.transpose(query, (0, 2, 1))                  # (N, Tq, C)
    if scale != 1.0:
        q_c = q_c * jnp.asarray(scale, q_c.dtype)          # scale hoisted out of the kernel
    q_c = q_c.astype(compute_dtype)
    k_c = key.astype(compute_dtype)                        # (N, C, S) native
    v_c = value.astype(compute_dtype)                      # (N, Cv, S) native, no transpose
    if mask is None:
        bias = jnp.zeros((n, 1, s_len), jnp.float32)
    else:
        bias = jnp.where(mask, _NEG_BIG, 0.0).astype(jnp.float32)[:, None, :]

    vmem_limit = _vmem_limit_bytes()
    bn = _choose_batch_block(n)
    nb = n // bn
    if s_tile is not None:
        ts = min(int(s_tile), s_len)
        if ts < s_len:
            assert ts % _LANE == 0, "s_tile must be a multiple of 128 when it tiles S"
    else:
        ts = _choose_s_tile(s_len, bn, c, cv, jnp.dtype(compute_dtype).itemsize,
                            vmem_limit)
    ns = pl.cdiv(s_len, ts)

    out_shape = jax.ShapeDtypeStruct((n, tq, cv), out_dtype)
    # TODO(synk): if Cv < 128 in production, pad Cv to 128 for lane-dense output
    # blocks (lane-sparse stores waste most of each vreg on the writeback path).

    if ns == 1:
        # Fast path: one-pass softmax, no scratch, no init/finalize branches.
        out_tcv = pl.pallas_call(
            _attn_single_tile_kernel,
            out_shape=out_shape,
            grid_spec=pltpu.PrefetchScalarGridSpec(
                num_scalar_prefetch=0,
                grid=(nb,),
                in_specs=[
                    pl.BlockSpec((bn, tq, c), lambda b: (b, 0, 0)),
                    pl.BlockSpec((bn, c, s_len), lambda b: (b, 0, 0)),
                    pl.BlockSpec((bn, cv, s_len), lambda b: (b, 0, 0)),
                    pl.BlockSpec((bn, 1, s_len), lambda b: (b, 0, 0)),
                ],
                out_specs=pl.BlockSpec((bn, tq, cv), lambda b: (b, 0, 0)),
            ),
            compiler_params=pltpu.CompilerParams(
                dimension_semantics=("parallel",),
                vmem_limit_bytes=vmem_limit,
            ),
        )(q_c, k_c, v_c, bias)
    else:
        kernel = functools.partial(_attn_flash_kernel, s_len=s_len, s_tile=ts)
        out_tcv = pl.pallas_call(
            kernel,
            out_shape=out_shape,
            grid_spec=pltpu.PrefetchScalarGridSpec(
                num_scalar_prefetch=0,
                grid=(nb, ns),                             # reduction (S) axis last
                in_specs=[
                    pl.BlockSpec((bn, tq, c), lambda b, si: (b, 0, 0)),
                    pl.BlockSpec((bn, c, ts), lambda b, si: (b, 0, si)),
                    pl.BlockSpec((bn, cv, ts), lambda b, si: (b, 0, si)),
                    pl.BlockSpec((bn, 1, ts), lambda b, si: (b, 0, si)),
                ],
                out_specs=pl.BlockSpec((bn, tq, cv), lambda b, si: (b, 0, 0)),
                scratch_shapes=[
                    pltpu.VMEM((bn, tq, 1), jnp.float32),    # m (running max)
                    pltpu.VMEM((bn, tq, 1), jnp.float32),    # l (running denom)
                    pltpu.VMEM((bn, tq, cv), jnp.float32),   # acc (running numerator)
                ],
            ),
            compiler_params=pltpu.CompilerParams(
                dimension_semantics=("parallel", "arbitrary"),
                vmem_limit_bytes=vmem_limit,
            ),
        )(q_c, k_c, v_c, bias)

    # Layout fix back to the PyTorch output layout (N, Cv, Tq).
    return jnp.transpose(out_tcv, (0, 2, 1))


# ---------------------------------------------------------------------------
# Reference (mirrors the kernel's compute-dtype rounding for fair comparison)
# ---------------------------------------------------------------------------
def _reference(query, key, value, mask, dim_model=None, compute_dtype=jnp.float32):
    scale = float(dim_model) ** (-0.5) if dim_model is not None else 1.0
    q = (jnp.transpose(query, (0, 2, 1)) * scale).astype(compute_dtype).astype(jnp.float32)
    k = key.astype(compute_dtype).astype(jnp.float32)
    v = value.astype(compute_dtype).astype(jnp.float32)
    logits = jnp.einsum("ntc,ncs->nts", q, k)
    logits = jnp.where(mask[:, None, :], -jnp.inf, logits)
    m = jnp.max(logits, axis=-1, keepdims=True)
    p = jnp.exp(logits - m)
    l = jnp.sum(p, axis=-1, keepdims=True)
    p = p.astype(compute_dtype).astype(jnp.float32)        # mirrors the kernel's PV precision
    glimpse = jnp.einsum("nts,nvs->ntv", p, v) / l
    return jnp.transpose(glimpse, (0, 2, 1))


if __name__ == "__main__":
    rng = jax.random.PRNGKey(0)
    k1, k2, k3, k4 = jax.random.split(rng, 4)

    # Case 1: typical small mmocr shapes; bf16 MXU path; single-S-tile fast path.
    N, C, Tq, S, Cv = 2, 32, 8, 16, 32
    dim_model = C
    query = jax.random.normal(k1, (N, C, Tq), dtype=jnp.float32)
    key = jax.random.normal(k2, (N, C, S), dtype=jnp.float32)
    value = jax.random.normal(k3, (N, Cv, S), dtype=jnp.float32)
    mask = jax.random.bernoulli(k4, p=0.3, shape=(N, S))
    mask = mask.at[:, 0].set(False)     # keep >=1 valid position per row

    out = dot_product_attention(query, key, value, mask, dim_model=dim_model)
    out = jax.block_until_ready(out)
    ref = _reference(query, key, value, mask, dim_model=dim_model,
                     compute_dtype=jnp.bfloat16)
    assert out.shape == (N, Cv, Tq)
    assert jnp.allclose(out, ref, atol=1e-2, rtol=1e-2), "bf16 path mismatch vs reference"

    # Case 2: multi-tile flash path with a ragged last S tile; f32 for exact parity.
    S2 = 300
    k5, k6, k7 = jax.random.split(k4, 3)
    key2 = jax.random.normal(k5, (N, C, S2), dtype=jnp.float32)
    value2 = jax.random.normal(k6, (N, Cv, S2), dtype=jnp.float32)
    mask2 = jax.random.bernoulli(k7, p=0.3, shape=(N, S2))
    mask2 = mask2.at[:, 0].set(False)

    out2 = dot_product_attention(query, key2, value2, mask2, dim_model=dim_model,
                                 compute_dtype=jnp.float32, s_tile=128)
    out2 = jax.block_until_ready(out2)
    ref2 = _reference(query, key2, value2, mask2, dim_model=dim_model,
                      compute_dtype=jnp.float32)
    assert out2.shape == (N, Cv, Tq)
    assert jnp.allclose(out2, ref2, atol=2e-3, rtol=2e-3), "flash path mismatch vs reference"

    print("KERNEL_OK")
</pallas_src>

<mosaic_0001>
module attributes {stable_mosaic.version = 11 : i64} {
  func.func @_attn_single_tile_kernel(%arg0: i32, %arg1: memref<1x8x32xbf16, #tpu.memory_space<vmem>>, %arg2: memref<1x32x16xbf16, #tpu.memory_space<vmem>>, %arg3: memref<1x32x16xbf16, #tpu.memory_space<vmem>>, %arg4: memref<1x1x16xf32, #tpu.memory_space<vmem>>, %arg5: memref<1x8x32xf32, #tpu.memory_space<vmem>>) attributes {dimension_semantics = [#tpu.dimension_semantics<parallel>], iteration_bounds = array<i64: 2>, scalar_prefetch = 0 : i64, scratch_operands = 0 : i64, tpu.core_type = #tpu.core_type<tc>, window_params = [{transform_indices = @transform_0, window_bounds = array<i64: 1, 8, 32>}, {transform_indices = @transform_1, window_bounds = array<i64: 1, 32, 16>}, {transform_indices = @transform_2, window_bounds = array<i64: 1, 32, 16>}, {transform_indices = @transform_3, window_bounds = array<i64: 1, 1, 16>}, {transform_indices = @transform_4, window_bounds = array<i64: 1, 8, 32>}]} {
    %c0 = arith.constant 0 : index
    %c0_0 = arith.constant 0 : index
    %c0_1 = arith.constant 0 : index
    %0 = vector.load %arg1[%c0, %c0_0, %c0_1] : memref<1x8x32xbf16, #tpu.memory_space<vmem>>, vector<1x8x32xbf16>
    %c0_2 = arith.constant 0 : index
    %c0_3 = arith.constant 0 : index
    %c0_4 = arith.constant 0 : index
    %1 = vector.load %arg2[%c0_2, %c0_3, %c0_4] : memref<1x32x16xbf16, #tpu.memory_space<vmem>>, vector<1x32x16xbf16>
    "tpu.trace_start"() <{level = 10 : i32, message = "btc,bcs->bts"}> : () -> ()
    %cst = arith.constant dense<0.000000e+00> : vector<1x8x16xf32>
    %2 = tpu.matmul %0, %1, %cst {dimension_numbers = #tpu.dot_dimension_numbers<[2], [1], [1], [2], [0, 0, 0, 1, 1, 2], [0], [0]>} : vector<1x8x32xbf16>, vector<1x32x16xbf16>, vector<1x8x16xf32> -> vector<1x8x16xf32>
    "tpu.trace_stop"() : () -> ()
    %c0_5 = arith.constant 0 : index
    %c0_6 = arith.constant 0 : index
    %c0_7 = arith.constant 0 : index
    %3 = vector.load %arg4[%c0_5, %c0_6, %c0_7] : memref<1x1x16xf32, #tpu.memory_space<vmem>>, vector<1x1x16xf32>
    %4 = vector.broadcast %3 : vector<1x1x16xf32> to vector<1x8x16xf32>
    %5 = arith.addf %2, %4 : vector<1x8x16xf32>
    %cst_8 = arith.constant dense<0xFF800000> : vector<1x8xf32>
    %6 = vector.multi_reduction <maximumf>, %5, %cst_8 [2] : vector<1x8x16xf32> to vector<1x8xf32>
    %7 = vector.shape_cast %6 : vector<1x8xf32> to vector<1x8x1xf32>
    %8 = vector.broadcast %7 : vector<1x8x1xf32> to vector<1x8x16xf32>
    %9 = arith.subf %5, %8 : vector<1x8x16xf32>
    %10 = math.exp %9 : vector<1x8x16xf32>
    %cst_9 = arith.constant dense<0.000000e+00> : vector<1x8xf32>
    %11 = vector.multi_reduction <add>, %10, %cst_9 [2] : vector<1x8x16xf32> to vector<1x8xf32>
    %12 = vector.shape_cast %11 : vector<1x8xf32> to vector<1x8x1xf32>
    %13 = arith.truncf %10 : vector<1x8x16xf32> to vector<1x8x16xbf16>
    %c0_10 = arith.constant 0 : index
    %c0_11 = arith.constant 0 : index
    %c0_12 = arith.constant 0 : index
    %14 = vector.load %arg3[%c0_10, %c0_11, %c0_12] : memref<1x32x16xbf16, #tpu.memory_space<vmem>>, vector<1x32x16xbf16>
    "tpu.trace_start"() <{level = 10 : i32, message = "bts,bvs->btv"}> : () -> ()
    %cst_13 = arith.constant dense<0.000000e+00> : vector<1x8x32xf32>
    %15 = tpu.matmul %13, %14, %cst_13 {dimension_numbers = #tpu.dot_dimension_numbers<[2], [2], [1], [1], [0, 0, 0, 1, 1, 1], [0], [0]>} : vector<1x8x16xbf16>, vector<1x32x16xbf16>, vector<1x8x32xf32> -> vector<1x8x32xf32>
    "tpu.trace_stop"() : () -> ()
    %16 = tpu.reciprocal %12 : vector<1x8x1xf32> -> vector<1x8x1xf32>
    %17 = vector.broadcast %16 : vector<1x8x1xf32> to vector<1x8x32xf32>
    %18 = arith.mulf %15, %17 : vector<1x8x32xf32>
    %c0_14 = arith.constant 0 : index
    %c0_15 = arith.constant 0 : index
    %c0_16 = arith.constant 0 : index
    %19 = vector.load %arg5[%c0_14, %c0_15, %c0_16] : memref<1x8x32xf32, #tpu.memory_space<vmem>>, vector<1x8x32xf32>
    tpu.vector_store %arg5[%c0_14, %c0_15, %c0_16], %18 {strides = array<i32>} : memref<1x8x32xf32, #tpu.memory_space<vmem>>, vector<1x8x32xf32>,
    return
  }
  func.func @transform_0(%arg0: i32) -> (i32, i32, i32) {
    %c0_i32 = arith.constant 0 : i32
    %c0_i32_0 = arith.constant 0 : i32
    %c0_i32_1 = arith.constant 0 : i32
    return %arg0, %c0_i32, %c0_i32_0 : i32, i32, i32
  }
  func.func @transform_1(%arg0: i32) -> (i32, i32, i32) {
    %c0_i32 = arith.constant 0 : i32
    %c0_i32_0 = arith.constant 0 : i32
    %c0_i32_1 = arith.constant 0 : i32
    return %arg0, %c0_i32, %c0_i32_0 : i32, i32, i32
  }
  func.func @transform_2(%arg0: i32) -> (i32, i32, i32) {
    %c0_i32 = arith.constant 0 : i32
    %c0_i32_0 = arith.constant 0 : i32
    %c0_i32_1 = arith.constant 0 : i32
    return %arg0, %c0_i32, %c0_i32_0 : i32, i32, i32
  }
  func.func @transform_3(%arg0: i32) -> (i32, i32, i32) {
    %c0_i32 = arith.constant 0 : i32
    %c0_i32_0 = arith.constant 0 : i32
    %c0_i32_1 = arith.constant 0 : i32
    return %arg0, %c0_i32, %c0_i32_0 : i32, i32, i32
  }
  func.func @transform_4(%arg0: i32) -> (i32, i32, i32) {
    %c0_i32 = arith.constant 0 : i32
    %c0_i32_0 = arith.constant 0 : i32
    %c0_i32_1 = arith.constant 0 : i32
    return %arg0, %c0_i32, %c0_i32_0 : i32, i32, i32
  }
}

</mosaic_0001>

<bundles_post_ra>
// kernel: tpu_custom_call.1
= control target key start
LH: loop header
LB: loop body
LE: loop exit
PB: predicated region body
PF: predicated region fallthrough
CT: control target
= control target key end

     0   :  { %9 = vsyncpa [#allocation3], 0  ;;  %s798_s0 = inlined_call_operand.vmem [shape: bf16[2,8,32], index: 0, kind: input, shape index: {}]   ;;  %s799_s1 = inlined_call_operand.vmem [shape: bf16[2,32,16], index: 1, kind: input, shape index: {}]   ;;  %s800_s2 = inlined_call_operand.vmem [shape: bf16[2,32,16], index: 2, kind: input, shape index: {}]   ;;  %s801_s3 = inlined_call_operand.vmem [shape: f32[2,1,16], index: 3, kind: input, shape index: {}]   ;;  %s802_s4 = inlined_call_operand.hbm [shape: f32[2,8,32], index: 4, kind: output, shape index: {}]  }
   0x1   :  { %11 = vsyncpa [#allocation3 + $0x1], 0  ;;  %s683_s15 = smov 0   ;;  %s685_s16 = smov 0  }
   0x2   :  { %s687_s17 = smov 0   ;;  %s689_s18 = smov 0  }
   0x3 LB: > { %s704_s19 = sadd.s32 4294967295, %s653_s18   ;;  %s499_s20 = sadd.s32 4294967294, %s653_s18   ;;  %s653_s18 = sphi %s689_s18, %s808_s18   ;;  %s649_s17 = sphi %s687_s17, %s807_s17   ;;  %s645_s16 = sphi %s685_s16, %s806_s16   ;;  %s641_s15 = sphi %s683_s15, %s805_s15  }
   0x4   : > { %s708_s21 = sadd.s32 1, %s653_s18   ;;  %s128_s22 = sadd.s32 1, %s649_s17 }
   0x5   : > { %s125_s23 = ssub.s32 %s653_s18, %s708_s21  ;;  %p138_p0 = scmp.ne.s32.totalorder %s649_s17, %s645_s16 }
   0x6   : > { %p126_p1 = scmp.eq.s32.totalorder %s125_s23, 0  ;;  %p139_p2 = scmp.eq.s32.totalorder %s704_s19, 1 }
   0x7   : > { %p144_p3 = scmp.ne.s32.totalorder %s645_s16, %s641_s15  ;;  %p145_p4 = scmp.eq.s32.totalorder %s499_s20, 1 }
   0x8   : > { %s719_s24 = scalar_select %p126_p1, %s649_s17, %s128_s22  }
   0x9   : > { %p721_p5 = por %p139_p2, %p138_p0  ;;  %p725_p6 = por %p145_p4, %p144_p3 }
   0xa   : > { %p502_p7 = scmp.ge.s32.totalorder %s653_s18, 1  ;;  %p192_p8 = scmp.lt.s32.totalorder %s653_s18, 3 }
   0xc   : > { %p193_p9 = pnand %p502_p7, %p192_p8 }
   0xd   : > { %p230_p10 = scmp.lt.s32.totalorder (!%p193_p9), %s704_s19, 1  ;;  %s227_s22 = sand.u32 (!%p193_p9), 1, %s645_s16  }
   0xe   : > { %196 = sbr.rel (%p193_p9) target bundleno = 594 (0x252), region = 36  ;;  %s503_s23 = sshll.u32 (!%p193_p9), %s227_s22, 3 }
   0xf   : > { %s657_s8 = smov (!%p193_p9), [#allocation2]  }
  0x13   : > { %v655_v0 = vmov 0.0   ;;  %vm656_vm0 = vmmov 0   ;;  %s231_s27 = scalar_select %p230_p10, %s704_s19, 1  ;;  %vm272_vm1 = vcmask 261120   ;;  %vm316_vm2 = vcmask 130048  }
  0x14   : > { %528 = vmatprep.subr.bf16.mxu0 %v655_v0  ;;  %532 = vmatprep.mubr.msk.bf16.mxu0 %vm656_vm0, %v655_v0 }
  0x15   : > { %536 = vmatprep.subr.bf16.mxu1 %v655_v0  ;;  %540 = vmatprep.mubr.msk.bf16.mxu1 %vm656_vm0, %v655_v0  ;;  %s520_s28 = sshll.u32 %s231_s27, 4  ;;  %s504_s6 = sshll.u32 %s231_s27, 2 }
  0x16   : > { %s238_s5 = scalar_lea.vmem %s799_s1, %s520_s28  ;;  %s233_s9 = scalar_lea.vmem %s798_s0, %s504_s6 }
  0x17   : > { %v585_v1 = vld [vmem:[%s238_s5 + $0x8] sm:$0xff]   ;;  %v586_v2 = vld [vmem:[%s238_s5] sm:$0xff]   ;;  %s246_s12 = scalar_lea.vmem %s801_s3, %s231_s27  ;;  %s243_s20 = scalar_lea.vmem %s800_s2, %s520_s28 }
  0x18   : > { %529 = vmatpush3.bf16.msra.mxu0 %v585_v1  ;;  %v248_v3 = vld [vmem:[%s233_s9] sm:$0xf]  ;;  %v587_v11 = vld [vmem:[%s243_s20 + $0x8] sm:$0xff]   ;;  %s517_s27 = sshll.u32 %s704_s19, 7  ;;  %s229_s28 = scalar_lea.vmem [#allocation2], %s503_s23 }
  0x19   : > { %530 = vmatprep.subr.bf16.mxu0 %v655_v0  ;;  %v509_v4 = vld [vmem:[%s246_s12] ss:$0 sm:$0xff]  ;;  %v348_v12 = vsel %vm316_vm2, %v587_v11, 0  ;;  %s407_s29 = sshll.u32 %s229_s28, 4  ;;  %s756_s6 = scalar_lea.hbm %s802_s4, %s517_s27  ;;  %s758_s29 = int_to_ptr.vmem [resolvable:$true] %s407_s29 }
  0x1a   : > { %537 = vmatpush3.bf16.xpose.msra.mxu1 %v348_v12  ;;  %v588_v13 = vld [vmem:[%s243_s20] sm:$0xff]   ;;  %s394_s19 = scalar_lea.sflag [#allocation3], %s227_s22  ;;  %s593_s7 = scalar_lea.vmem %s758_s29, 128 }
  0x1b   : > { %538 = vmatprep.subr.bf16.mxu1 %v655_v0  ;;  %v345_v14 = vsel %vm316_vm2, %v588_v13, 0  ;;  %p594_p11 = scmp.ne.s32.totalorder %s758_s29, %s593_s7  ;;  %s597_s9 = sshll.u32 %s657_s8, 4  ;;  %s598_s9 = int_to_ptr.vmem [resolvable:$false] %s597_s9 }
  0x1c   : > { %531 = vmatpush3.bf16.msra.mxu0 %v586_v2  ;;  %s599_s10 = scalar_lea.vmem %s598_s9, 256  ;;  %p600_p0 = scmp.lt.s32.totalorder %s758_s29, %s598_s9 }
  0x1d   : > { %p595_p12 = pnand %p594_p11, %p721_p5  ;;  %p601_p1 = scmp.lt.s32.totalorder %s599_s10, %s593_s7 }
  0x1f   : > { %533 = vmatmul.mubr.msk.bf16.vlgmr.msra.gmra.mxu0 %vm272_vm1, %v248_v3  ;;  %p596_p13 = pneg %p595_p12  ;;  %p602_p2 = por %p601_p1, %p600_p0 }
  0x21   : > { %p603_p3 = pnand %p602_p2, %p596_p13 }
  0x22   : > { %539 = vmatpush3.bf16.xpose.msra.mxu1 %v345_v14 }
  0xdf   : > { %v310_v5 = vpop.f32.mrf.mxu0 }
  0xe0   : > { %v311_v6 = vadd.f32 %v509_v4, %v310_v5 }
  0xe1   : > { %v534_v7 = vpop.f32.mrf.mxu0 }
  0xe2   : > { %v317_v8 = vsel %vm316_vm2, %v311_v6, -inf }
  0xe3   : > { %318 = vmax.xlane.f32.xlu0 %v317_v8  ;;  %v313_v9 = vpop.f32.mrf.mxu0 }
  0xe5   : > { %v535_v10 = vpop.f32.mrf.mxu0 }
 0x16c   : > { %v319_v15 = vpop.xlane.xlu0 %318 }
 0x16d   : > { %v320_v16 = vsub.f32 %v311_v6, %v319_v15 }
 0x16f   : > { %v321_v17 = vmul.f32 1.442695, %v320_v16 }
 0x171   : > { %589 = vpow2.f32 %v321_v17 }
 0x17e   : > { %v590_v18 = vpop.eup %589 }
 0x17f   : > { %v323_v19 = vsel %vm316_vm2, %v590_v18, 0.0  ;;  %v326_v20 = vpack.c.bf16 %v590_v18, %v590_v18 }
 0x180   : > { %324 = vadd.xlane.f32.xlu0 %v323_v19 }
 0x181   : > { %541 = vmatmul.mubr.msk.bf16.vlgmr.msra.gmra.mxu1 %vm316_vm2, %v326_v20 }
 0x209   : > { %v325_v21 = vpop.xlane.xlu0 %324 }
 0x20a   : > { %591 = vrcp.f32 %v325_v21 }
 0x217   : > { %v592_v22 = vpop.eup %591 }
 0x241   : > { %v384_v23 = vpop.f32.mrf.mxu1 }
 0x242   : > { %v391_v24 = vmul.f32 %v592_v22, %v384_v23 }
 0x243   : > { %v542_v25 = vpop.f32.mrf.mxu1 }
 0x244   : > { %392 = vst.msk [vmem:[%s229_s28] sm:$0xff] %vm272_vm1, %v391_v24 }
 0x245   : > { %v387_v26 = vpop.f32.mrf.mxu1 }
 0x246   : > { %606 = shalt.err (!%p603_p3)
}
 0x247   : > { %s607_s11 = scalar_lea.hbm %s756_s6, 128  ;;  %s611_s14 = scalar_lea.hbm %s802_s4, 256 }
 0x248   : > { %p608_p4 = scmp.ne.s32.totalorder %s756_s6, %s607_s11  ;;  %p612_p9 = scmp.lt.s32.totalorder %s756_s6, %s802_s4 }
 0x249   : > { %p613_p10 = scmp.lt.s32.totalorder %s611_s14, %s607_s11 }
 0x24a   : > { %p609_p7 = pnand %p608_p4, %p721_p5 }
 0x24b   : > { %p614_p11 = por %p613_p10, %p612_p9 }
 0x24c   : > { %p610_p8 = pneg %p609_p7 }
 0x24e   : > { %p615_p12 = pnand %p614_p11, %p610_p8 }
 0x250   : > { %618 = shalt.err (!%p615_p12)
}
 0x251   : > { %544 = dma.vmem_to_hbm [thread:$0]  (%p721_p5), %s758_s29, 128, %s756_s6, %s394_s19   ;;  %v543_v27 = vpop.f32.mrf.mxu1 }
 0x252 PF: > { %p550_p13 = scmp.ge.s32.totalorder %s653_s18, 2  ;;  %s419_s23 = sand.u32 1, %s641_s15  }
 0x253   : > { %s420_s27 = scalar_lea.sflag [#allocation3], %s419_s23 }
 0x254   : > { %p547_p0 = pnand %p550_p13, %p725_p6 }
 0x256   : > { %p548_p1 = pneg %p547_p0 }
 0x258   : > { %636 = dma.done.wait (%p548_p1), %s420_s27, 128  }
 0x259   : > { %638 = vsyncadd (%p548_p1), %s420_s27, 4294967168  ;;  %p14_p2 = scmp.ge.s32.totalorder %s708_s21, 4   ;;  %s805_s15 = smov %s645_s16 }
 0x25a   : > { %s806_s16 = smov %s649_s17  ;;  %s807_s17 = smov %s719_s24 }
 0x25b   : > { %s808_s18 = smov %s708_s21  ;;  %16 = sbr.rel (!%p14_p2) target bundleno = 3 (0x3), region = 80 }
 0x260   :  { %425 = vsyncpa [#allocation3], 1 }
 0x261   :  { %427 = vsyncpa [#allocation3 + $0x1], 1 }

</bundles_post_ra>
